<compile_context>
chip_gen: v5e
topology: v5e:2x2
jax: 0.10.0
libtpu: 0.0.40
codegen_flags: <defaults>
</compile_context>

<pallas_src>
import jax
import jax.numpy as jnp
from jax import lax
from jax.experimental import pallas as pl
from jax.experimental.pallas import tpu as pltpu


def _round_up(a, b):
    return -(-a // b) * b


def _vmem_budget_and_limit():
    """Generation-aware VMEM tile budget and compiler vmem limit (bytes)."""
    cap = 64 * 1024 * 1024  # conservative fallback (v7x physical VMEM per TC)
    try:
        info = pltpu.get_tpu_info()
        cap = int(getattr(info, "vmem_capacity_bytes", cap)) or cap
    except Exception:
        pass
    limit = max(16 * 1024 * 1024, min(cap * 3 // 4, 96 * 1024 * 1024))
    budget = max(8 * 1024 * 1024, min(cap // 2, 48 * 1024 * 1024))
    budget = min(budget, limit - 4 * 1024 * 1024)
    return budget, limit


def _make_squeeze_kernel(tile_l, lane, L_total, ragged_l):
    num_groups = tile_l // lane  # tile_l is `lane` (L<=128) or a multiple of 128

    def kernel(x_ref, scale_ref, o_ref, acc_ref):
        # x_ref:     (tile_n, C, tile_l) block of native-layout x, L on lanes
        # scale_ref: (1, C)  prefused gamma / L (f32)
        # o_ref:     (tile_n, 1, C) output block
        # acc_ref:   (tile_n, C, lane) f32 accumulator, resident across the L grid axis
        l_step = pl.program_id(1)

        @pl.when(l_step == 0)
        def _init():
            acc_ref[...] = jnp.zeros_like(acc_ref)

        blk_n, blk_c, _ = x_ref.shape

        if ragged_l:
            base = (lax.broadcasted_iota(jnp.int32, (blk_n, blk_c, lane), 2)
                    + l_step * tile_l)

        def load_group(g):
            # Static, 128-aligned lane slice -> plain VPU work, no relayout.
            v = x_ref[:, :, g * lane:(g + 1) * lane].astype(jnp.float32)
            if ragged_l:
                v = jnp.where(base + g * lane < L_total, v, 0.0)
            return v

        partial = load_group(0)
        for g in range(1, num_groups):
            partial = partial + load_group(g)
        acc_ref[...] += partial

        @pl.when(l_step == pl.num_programs(1) - 1)
        def _finalize():
            pooled = jnp.sum(acc_ref[...], axis=-1)          # single XLU lane reduce
            out = pooled * scale_ref[...]                    # (tile_n, C) * (1, C): gamma / L
            o_ref[...] = out[:, None, :].astype(o_ref.dtype)

    return kernel


_MAX_TILE_L = 32 * 128   # cap unrolled lane-group fold at 32 VPU adds per grid step


def squeeze_forward(x, gamma):
    """AdaptiveAvgPool1d(1) -> Flatten -> LayerScaler.  x: (N, C, L), gamma: (C,) -> (N, C)."""
    N, C, L = x.shape
    itemsize = jnp.dtype(x.dtype).itemsize

    budget, vmem_limit = _vmem_budget_and_limit()

    sub = {4: 8, 2: 16, 1: 32}.get(itemsize, 8)
    pad_c_in = _round_up(C, sub)        # input sublane padding (dtype dependent)
    pad_c_f32 = _round_up(C, 8)         # f32 accumulator sublane padding
    pad_c_lane = _round_up(C, 128)      # lane padding where C sits on lanes (output / scale)

    def vmem_estimate(tn, tl, lane):
        in_b = 2 * tn * pad_c_in * _round_up(tl, 128) * itemsize   # double-buffered input
        acc_b = tn * pad_c_f32 * _round_up(lane, 128) * 4          # f32 scratch
        out_b = 2 * tn * 8 * pad_c_lane * itemsize                 # double-buffered output
        scale_b = 2 * 8 * pad_c_lane * 4
        return in_b + acc_b + out_b + scale_b

    # --- L tiling: L on lanes, multiples of 128 (or the full axis when L <= 128) ---
    if L <= 128:
        tile_l, lane = L, L
    else:
        lane = 128
        max_tl = min((L // 128) * 128, _MAX_TILE_L)
        if vmem_estimate(1, max_tl, lane) <= budget:
            tile_l = max_tl
        else:
            tile_l = 128
            while tile_l * 2 <= max_tl and vmem_estimate(1, tile_l * 2, lane) <= budget:
                tile_l *= 2
    ragged_l = (L % tile_l) != 0
    grid_l = pl.cdiv(L, tile_l)

    # --- N tiling: divisor tiles; keep >= 2 parallel blocks (when N >= 2) for v7x megacore ---
    tile_n = 1
    if N >= 2:
        for tn in (32, 16, 8, 4, 2):
            if N % tn == 0 and tn <= N // 2 and vmem_estimate(tn, tile_l, lane) <= budget:
                tile_n = tn
                break
    grid_n = N // tile_n

    # Pre-fuse the mean's 1/L into the LayerScaler gamma: applied exactly once at finalize.
    scale = (gamma.astype(jnp.float32) * (1.0 / float(L))).reshape(1, C)

    kernel = _make_squeeze_kernel(tile_l, lane, L, ragged_l)

    cost = pl.CostEstimate(
        flops=int(N * C * (L + 1)),
        transcendentals=0,
        bytes_accessed=int(N * C * L * itemsize + N * C * itemsize + C * 4),
    )

    out3 = pl.pallas_call(
        kernel,
        out_shape=jax.ShapeDtypeStruct((N, 1, C), x.dtype),
        grid_spec=pltpu.PrefetchScalarGridSpec(
            num_scalar_prefetch=0,
            grid=(grid_n, grid_l),          # reduction axis (L) last
            in_specs=[
                pl.BlockSpec((tile_n, C, tile_l), lambda i, l: (i, 0, l)),
                pl.BlockSpec((1, C), lambda i, l: (0, 0)),
            ],
            out_specs=pl.BlockSpec((tile_n, 1, C), lambda i, l: (i, 0, 0)),
            scratch_shapes=[pltpu.VMEM((tile_n, C, lane), jnp.float32)],
        ),
        compiler_params=pltpu.CompilerParams(
            dimension_semantics=("parallel", "arbitrary"),
            vmem_limit_bytes=int(vmem_limit),
        ),
        cost_estimate=cost,
    )(x, scale)

    return out3.reshape(N, C)


def squeeze_reference(x, gamma):
    return (jnp.mean(x.astype(jnp.float32), axis=-1) * gamma[None, :]).astype(x.dtype)


if __name__ == "__main__":
    key = jax.random.PRNGKey(0)

    # Small shapes consistent with the module: batch=2, hidden_dim=32, seq_len=16.
    batch, hidden_dim, seq_len, init_scale = 2, 32, 16, 1.0
    k1, k2, k3 = jax.random.split(key, 3)

    x = jax.random.normal(k1, (batch, hidden_dim, seq_len), dtype=jnp.float32)
    gamma = init_scale * jnp.ones((hidden_dim,), dtype=jnp.float32)   # LayerScaler init

    out = jax.block_until_ready(squeeze_forward(x, gamma))
    ref = squeeze_reference(x, gamma)
    assert out.shape == (batch, hidden_dim)
    assert jnp.allclose(out, ref, atol=1e-5, rtol=1e-5), "mismatch vs reference"

    # Also exercise the multi-step + ragged-L accumulation/mask path (L not a multiple of 128).
    L2 = 300
    x2 = jax.random.normal(k2, (batch, hidden_dim, L2), dtype=jnp.float32)
    gamma2 = jax.random.normal(k3, (hidden_dim,), dtype=jnp.float32)  # "trained" LayerScaler
    out2 = jax.block_until_ready(squeeze_forward(x2, gamma2))
    ref2 = squeeze_reference(x2, gamma2)
    assert jnp.allclose(out2, ref2, atol=1e-4, rtol=1e-4), "mismatch (ragged L) vs reference"

    print("KERNEL_OK")
</pallas_src>

<mosaic_0001>
module attributes {stable_mosaic.version = 11 : i64} {
  func.func @kernel(%arg0: i32, %arg1: i32, %arg2: memref<1x32x16xf32, #tpu.memory_space<vmem>>, %arg3: memref<1x32xf32, #tpu.memory_space<vmem>>, %arg4: memref<1x1x32xf32, #tpu.memory_space<vmem>>, %arg5: memref<1x32x16xf32, #tpu.memory_space<vmem>>) attributes {dimension_semantics = [#tpu.dimension_semantics<parallel>, #tpu.dimension_semantics<arbitrary>], iteration_bounds = array<i64: 2, 1>, scalar_prefetch = 0 : i64, scratch_operands = 1 : i64, tpu.core_type = #tpu.core_type<tc>, window_params = [{transform_indices = @transform_0, window_bounds = array<i64: 1, 32, 16>}, {pipeline_mode = #tpu.pipeline_mode<synchronous>, transform_indices = @transform_1, window_bounds = array<i64: 1, 32>}, {transform_indices = @transform_2, window_bounds = array<i64: 1, 1, 32>}]} {
    %c0_i32 = arith.constant 0 : i32
    %0 = arith.cmpi eq, %arg1, %c0_i32 : i32
    %1 = arith.extui %0 : i1 to i32
    %c0_i32_0 = arith.constant 0 : i32
    %2 = arith.cmpi ne, %1, %c0_i32_0 : i32
    scf.if %2 {
      %cst = arith.constant 0.000000e+00 : f32
      %10 = vector.broadcast %cst : f32 to vector<1x32x16xf32>
      %c0_11 = arith.constant 0 : index
      %c0_12 = arith.constant 0 : index
      %c0_13 = arith.constant 0 : index
      %11 = vector.load %arg5[%c0_11, %c0_12, %c0_13] : memref<1x32x16xf32, #tpu.memory_space<vmem>>, vector<1x32x16xf32>
      tpu.vector_store %arg5[%c0_11, %c0_12, %c0_13], %10 {strides = array<i32>} : memref<1x32x16xf32, #tpu.memory_space<vmem>>, vector<1x32x16xf32>,
    } else {
    }
    %c0 = arith.constant 0 : index
    %c0_1 = arith.constant 0 : index
    %c0_2 = arith.constant 0 : index
    %3 = vector.load %arg2[%c0, %c0_1, %c0_2] : memref<1x32x16xf32, #tpu.memory_space<vmem>>, vector<1x32x16xf32>
    %c0_3 = arith.constant 0 : index
    %c0_4 = arith.constant 0 : index
    %c0_5 = arith.constant 0 : index
    %4 = vector.load %arg5[%c0_3, %c0_4, %c0_5] : memref<1x32x16xf32, #tpu.memory_space<vmem>>, vector<1x32x16xf32>
    %5 = arith.addf %4, %3 : vector<1x32x16xf32>
    %c0_6 = arith.constant 0 : index
    %c0_7 = arith.constant 0 : index
    %c0_8 = arith.constant 0 : index
    %6 = vector.load %arg5[%c0_6, %c0_7, %c0_8] : memref<1x32x16xf32, #tpu.memory_space<vmem>>, vector<1x32x16xf32>
    tpu.vector_store %arg5[%c0_6, %c0_7, %c0_8], %5 {strides = array<i32>} : memref<1x32x16xf32, #tpu.memory_space<vmem>>, vector<1x32x16xf32>,
    %c0_i32_9 = arith.constant 0 : i32
    %7 = arith.cmpi eq, %arg1, %c0_i32_9 : i32
    %8 = arith.extui %7 : i1 to i32
    %c0_i32_10 = arith.constant 0 : i32
    %9 = arith.cmpi ne, %8, %c0_i32_10 : i32
    scf.if %9 {
      %c0_11 = arith.constant 0 : index
      %c0_12 = arith.constant 0 : index
      %c0_13 = arith.constant 0 : index
      %10 = vector.load %arg5[%c0_11, %c0_12, %c0_13] : memref<1x32x16xf32, #tpu.memory_space<vmem>>, vector<1x32x16xf32>
      %cst = arith.constant dense<0.000000e+00> : vector<1x32xf32>
      %11 = vector.multi_reduction <add>, %10, %cst [2] : vector<1x32x16xf32> to vector<1x32xf32>
      %c0_14 = arith.constant 0 : index
      %c0_15 = arith.constant 0 : index
      %12 = vector.load %arg3[%c0_14, %c0_15] : memref<1x32xf32, #tpu.memory_space<vmem>>, vector<1x32xf32>
      %13 = arith.mulf %11, %12 : vector<1x32xf32>
      %14 = vector.shape_cast %13 : vector<1x32xf32> to vector<1x1x32xf32>
      %c0_16 = arith.constant 0 : index
      %c0_17 = arith.constant 0 : index
      %c0_18 = arith.constant 0 : index
      %15 = vector.load %arg4[%c0_16, %c0_17, %c0_18] : memref<1x1x32xf32, #tpu.memory_space<vmem>>, vector<1x1x32xf32>
      tpu.vector_store %arg4[%c0_16, %c0_17, %c0_18], %14 {strides = array<i32>} : memref<1x1x32xf32, #tpu.memory_space<vmem>>, vector<1x1x32xf32>,
    } else {
    }
    return
  }
  func.func @transform_0(%arg0: i32, %arg1: i32) -> (i32, i32, i32) {
    %c0_i32 = arith.constant 0 : i32
    %c0_i32_0 = arith.constant 0 : i32
    return %arg0, %c0_i32, %arg1 : i32, i32, i32
  }
  func.func @transform_1(%arg0: i32, %arg1: i32) -> (i32, i32) {
    %c0_i32 = arith.constant 0 : i32
    %c0_i32_0 = arith.constant 0 : i32
    %c0_i32_1 = arith.constant 0 : i32
    return %c0_i32, %c0_i32_0 : i32, i32
  }
  func.func @transform_2(%arg0: i32, %arg1: i32) -> (i32, i32, i32) {
    %c0_i32 = arith.constant 0 : i32
    %c0_i32_0 = arith.constant 0 : i32
    %c0_i32_1 = arith.constant 0 : i32
    return %arg0, %c0_i32, %c0_i32_0 : i32, i32, i32
  }
}

</mosaic_0001>

<bundles_post_ra>
// kernel: tpu_custom_call.1
= control target key start
LH: loop header
LB: loop body
LE: loop exit
PB: predicated region body
PF: predicated region fallthrough
CT: control target
= control target key end

     0   :  { %7 = vsyncpa [#allocation4], 0  ;;  %s646_s0 = inlined_call_operand.vmem [shape: f32[2,32,16], index: 0, kind: input, shape index: {}]   ;;  %s647_s1 = inlined_call_operand.vmem [shape: f32[1,32], index: 1, kind: input, shape index: {}]   ;;  %s648_s2 = inlined_call_operand.hbm [shape: f32[2,1,32], index: 2, kind: output, shape index: {}]  }
   0x1   :  { %9 = vsyncpa [#allocation4 + $0x1], 0  ;;  %s532_s9 = smov 0   ;;  %s534_s10 = smov 0  }
   0x2   :  { %s536_s11 = smov 0   ;;  %s538_s12 = smov 0  }
   0x3   :  { %s540_s13 = smov 0   ;;  %s542_s14 = smov 0  }
   0x4 LB: > { %s360_s15 = sadd.s32 4294967295, %s513_s14   ;;  %s361_s16 = sadd.s32 4294967294, %s513_s14   ;;  %s513_s14 = sphi %s542_s14, %s15_s14   ;;  %s509_s13 = sphi %s540_s13, %s655_s13   ;;  %s505_s12 = sphi %s538_s12, %s654_s12   ;;  %s501_s11 = sphi %s536_s11, %s653_s11   ;;  %s497_s10 = sphi %s534_s10, %s652_s10   ;;  %s493_s9 = sphi %s532_s9, %s651_s9  }
   0x5   : > { %s27_s17 = sadd.s32 1, %s509_s13  ;;  %s83_s18 = sadd.s32 1, %s501_s11 }
   0x6   : > { %p29_p0 = scmp.ge.s32.totalorder %s27_s17, 2  ;;  %p93_p1 = scmp.ne.s32.totalorder %s501_s11, %s497_s10 }
   0x7   : > { %p94_p2 = scmp.eq.s32.totalorder %s360_s15, 1  ;;  %p99_p3 = scmp.ne.s32.totalorder %s497_s10, %s493_s9 }
   0x8   : > { %s657_s17 = smov (%p29_p0, %s27_s17), 0  ;;  %p100_p5 = scmp.eq.s32.totalorder %s361_s16, 1 }
   0x9   : > { %p572_p4 = por %p94_p2, %p93_p1  ;;  %s80_s20 = ssub.s32 %s509_s13, %s657_s17 }
   0xa   : > { %p364_p6 = scmp.ge.s32.totalorder %s513_s14, 1  ;;  %p81_p7 = scmp.eq.s32.totalorder %s80_s20, 0 }
   0xb   : > { %p579_p8 = por %p100_p5, %p99_p3  ;;  %p132_p9 = scmp.lt.s32.totalorder %s513_s14, 3 }
   0xc   : > { %s585_s22 = scalar_select %p81_p7, %s501_s11, %s83_s18  }
   0xd   : > { %p133_p10 = pnand %p364_p6, %p132_p9 }
   0xe   : > { %p156_p11 = scmp.lt.s32.totalorder (!%p133_p10), %s505_s12, 1  ;;  %s154_s30 = sand.u32 (!%p133_p10), 1, %s497_s10  }
   0xf   : > { %136 = sbr.rel (%p133_p10) target bundleno = 319 (0x13f), region = 28  ;;  %s287_s5 = scalar_lea.hbm (!%p133_p10), %s648_s2, %s505_s12 }
  0x10   : > { %s155_s6 = scalar_lea.vmem (!%p133_p10), [#allocation3], %s154_s30  ;;  %s291_s8 = sshll.u32 (!%p133_p10), %s287_s5, 4  ;;  %s292_s8 = int_to_ptr.hbm [resolvable:$true] %s291_s8 }
  0x11   : > { %s289_s7 = sshll.u32 (!%p133_p10), %s155_s6, 4  ;;  %s449_s15 = sshra.s32 (!%p133_p10), %s292_s8, 4  ;;  %s290_s7 = int_to_ptr.vmem [resolvable:$true] %s289_s7  ;;  %s450_s15 = int_to_ptr.hbm [resolvable:$true] %s449_s15 }
  0x12   : > { %s451_s16 = scalar_lea.hbm (!%p133_p10), %s450_s15, 1  ;;  %p456_p1 = scmp.lt.s32.totalorder (!%p133_p10), %s450_s15, %s648_s2 }
  0x13   : > { %p452_p12 = scmp.ne.s32.totalorder (!%p133_p10), %s450_s15, %s451_s16 }
  0x14   : > { %v212_v0 = vlaneseq  ;;  %vm168_vm0 = vcmask 130048   ;;  %s157_s23 = scalar_select %p156_p11, %s505_s12, 1  ;;  %v515_v2 = vmov 0.0   ;;  %v434_v9 = vld [vmem:[%s647_s1] ss:$0 sm:$0xff]  ;;  %v516_v27 = vmov 0  }
  0x15   : > { %171 = vst.msk [vmem:[#allocation2 + $0x10] sm:$0xff] %vm168_vm0, %v515_v2  ;;  %vm265_vm1 = vcmask 130112   ;;  %vm269_vm2 = vcmask 195712   ;;  %vm273_vm3 = vcmask 261312   ;;  %vm276_vm4 = vcmask 253952   ;;  %s279_s12 = scalar_lea.sflag [#allocation4], %s154_s30  ;;  %p453_p13 = pnand %p452_p12, %p572_p4 }
  0x16   : > { %v213_v1 = vshrl.u32 %v212_v0, 7  ;;  %169 = vst.msk [vmem:[#allocation2] sm:$0xff] %vm168_vm0, %v515_v2  ;;  %s369_s24 = sshll.u32 %s157_s23, 5  ;;  %v261_v41 = vand.u32 127, %v212_v0  ;;  %s455_s23 = scalar_lea.hbm %s648_s2, 2 }
  0x17   : > { %170 = vst.msk [vmem:[#allocation2 + $0x8] sm:$0xff] %vm168_vm0, %v515_v2  ;;  %s163_s27 = scalar_lea.vmem %s646_s0, %s369_s24  ;;  %p454_p0 = pneg %p453_p13 }
  0x18   : > { %v220_v3 = vadd.s32 8, %v213_v1  ;;  %427 = vset.pattern.permute.xlu1 %v213_v1  ;;  %v226_v4 = vadd.s32 16, %v213_v1  ;;  %172 = vst.msk [vmem:[#allocation2 + $0x18] sm:$0xff] %vm168_vm0, %v515_v2  ;;  %v175_v5 = vld [vmem:[%s163_s27 + $0x10] sm:$0xff]  ;;  %v173_v6 = vld [vmem:[%s163_s27] sm:$0xff]  ;;  %v174_v8 = vld [vmem:[%s163_s27 + $0x8] sm:$0xff]  ;;  %p457_p2 = scmp.lt.s32.totalorder %s455_s23, %s451_s16 }
  0x19   : > { %v176_v15 = vld [vmem:[%s163_s27 + $0x18] sm:$0xff]  ;;  %v232_v25 = vadd.s32 24, %v213_v1  ;;  %v263_v42 = vadd.s32 4294967288, %v261_v41  ;;  %v267_v45 = vadd.s32 4294967280, %v261_v41  ;;  %v271_v48 = vadd.s32 4294967272, %v261_v41 }
  0x1a   : > { %428 = vset.pattern.permute.xlu2 %v220_v3  ;;  %429 = vset.pattern.permute.xlu0 %v226_v4  ;;  %p458_p3 = por %p457_p2, %p456_p1 }
  0x1c   : > { %v179_v7 = vld [vmem:[#allocation2 + $0x10] sm:$0xff]  ;;  %p459_p5 = pnand %p458_p3, %p454_p0 }
  0x1d   : > { %v183_v10 = vadd.f32 %v179_v7, %v175_v5  ;;  %v177_v11 = vld [vmem:[#allocation2] sm:$0xff] }
  0x1e   : > { %v181_v12 = vadd.f32 %v177_v11, %v173_v6  ;;  %v178_v13 = vld [vmem:[#allocation2 + $0x8] sm:$0xff] }
  0x1f   : > { %188 = vst.msk [vmem:[#allocation2 + $0x10] sm:$0xff] %vm168_vm0, %v183_v10  ;;  %v182_v14 = vadd.f32 %v178_v13, %v174_v8  ;;  %v180_v16 = vld [vmem:[#allocation2 + $0x18] sm:$0xff] }
  0x20   : > { %186 = vst.msk [vmem:[#allocation2] sm:$0xff] %vm168_vm0, %v181_v12  ;;  %v184_v18 = vadd.f32 %v180_v16, %v176_v15 }
  0x21   : > { %187 = vst.msk [vmem:[#allocation2 + $0x8] sm:$0xff] %vm168_vm0, %v182_v14 }
  0x22   : > { %222 = vperm.xlu2 %428, %v434_v9   ;;  %189 = vst.msk [vmem:[#allocation2 + $0x18] sm:$0xff] %vm168_vm0, %v184_v18 }
  0x26   : > { %v195_v17 = vld [vmem:[#allocation2 + $0x10] sm:$0xff] }
  0x27   : > { %v203_v19 = vsel %vm168_vm0, %v195_v17, 0.0  ;;  %v193_v20 = vld [vmem:[#allocation2] sm:$0xff] }
  0x28   : > { %204 = vadd.xlane.f32.xlu1 %v203_v19  ;;  %v197_v21 = vsel %vm168_vm0, %v193_v20, 0.0  ;;  %v194_v22 = vld [vmem:[#allocation2 + $0x8] sm:$0xff] }
  0x29   : > { %198 = vadd.xlane.f32.xlu0 %v197_v21  ;;  %v200_v23 = vsel %vm168_vm0, %v194_v22, 0.0  ;;  %v196_v24 = vld [vmem:[#allocation2 + $0x18] sm:$0xff] }
  0x2a   : > { %v206_v26 = vsel %vm168_vm0, %v196_v24, 0.0  ;;  %432 = vset.pattern.permute.xlu2 %v516_v27 }
  0x31   : > { %201 = vadd.xlane.f32.xlu0 %v200_v23 }
  0x41   : > { %216 = vperm.xlu1 %427, %v434_v9  }
  0x45   : > { %228 = vperm.xlu0 %429, %v434_v9  }
  0x49   : > { %430 = vset.pattern.permute.xlu1 %v232_v25 }
  0x4b   : > { %207 = vadd.xlane.f32.xlu2 %v206_v26 }
  0x4d   : > { %433 = vset.pattern.permute.xlu0 %v516_v27 }
  0x51   : > { %234 = vperm.xlu1 %430, %v434_v9  }
  0x59   : > { %431 = vset.pattern.permute.xlu1 %v516_v27 }
  0x7c   : > { %v223_v35 = vpop.permute.xlu2 %222 }
  0x9b   : > { %v205_v29 = vpop.xlane.xlu1 %204 }
  0x9c   : > { %v199_v28 = vpop.xlane.xlu0 %198 }
  0xa4   : > { %v202_v30 = vpop.xlane.xlu0 %201 }
  0xa5   : > { %v241_v36 = vmul.f32 %v223_v35, %v202_v30 }
  0xb3   : > { %v217_v31 = vpop.permute.xlu1 %216 }
  0xb4   : > { %v240_v32 = vmul.f32 %v217_v31, %v199_v28 }
  0xb6   : > { %249 = vperm.xlu1 %431, %v240_v32  }
  0xb7   : > { %v229_v33 = vpop.permute.xlu0 %228 }
  0xb8   : > { %v242_v34 = vmul.f32 %v229_v33, %v205_v29 }
  0xba   : > { %255 = vperm.xlu2 %432, %v242_v34  }
  0xbe   : > { %252 = vperm.xlu1 %431, %v241_v36   ;;  %v208_v37 = vpop.xlane.xlu2 %207 }
  0xc3   : > { %v235_v38 = vpop.permute.xlu1 %234 }
  0xc4   : > { %v243_v39 = vmul.f32 %v235_v38, %v208_v37 }
  0xc6   : > { %258 = vperm.xlu0 %433, %v243_v39  }
 0x114   : > { %v256_v46 = vpop.permute.xlu2 %255 }
 0x115   : > { %v268_v50 = vperm.slane %v256_v46, %v267_v45 }
 0x128   : > { %v250_v40 = vpop.permute.xlu1 %249 }
 0x129   : > { %v262_v47 = vperm.slane %v250_v40, %v261_v41 }
 0x130   : > { %v253_v43 = vpop.permute.xlu1 %252 }
 0x131   : > { %v264_v44 = vperm.slane %v253_v43, %v263_v42 }
 0x133   : > { %v266_v49 = vsel %vm265_vm1, %v264_v44, %v262_v47 }
 0x134   : > { %v270_v53 = vsel %vm269_vm2, %v268_v50, %v266_v49 }
 0x138   : > { %v259_v51 = vpop.permute.xlu0 %258 }
 0x139   : > { %v272_v52 = vperm.slane %v259_v51, %v271_v48 }
 0x13b   : > { %v274_v54 = vsel %vm273_vm3, %v272_v52, %v270_v53 }
 0x13c   : > { %277 = vst.msk [vmem:[%s155_s6] sm:$0x1] %vm276_vm4, %v274_v54 }
 0x13d   : > { %462 = shalt.err (!%p459_p5)
}
 0x13e   : > { %370 = dma.vmem_to_hbm [thread:$0]  (%p572_p4), %s290_s7, 16, %s292_s8, %s279_s12  }
 0x13f PF: > { %p376_p6 = scmp.ge.s32.totalorder %s513_s14, 2  ;;  %s303_s26 = sand.u32 1, %s493_s9  }
 0x140   : > { %s304_s27 = scalar_lea.sflag [#allocation4], %s303_s26 }
 0x141   : > { %p373_p7 = pnand %p376_p6, %p579_p8 }
 0x143   : > { %p374_p9 = pneg %p373_p7 }
 0x145   : > { %488 = dma.done.wait (%p374_p9), %s304_s27, 16  }
 0x146   : > { %490 = vsyncadd (%p374_p9), %s304_s27, 4294967280  ;;  %s15_s14 = sadd.s32 1, %s513_s14   ;;  %s651_s9 = smov %s497_s10 }
 0x147   : > { %p12_p10 = scmp.ge.s32.totalorder %s15_s14, 4   ;;  %s652_s10 = smov %s501_s11 }
 0x148   : > { %s653_s11 = smov %s585_s22  ;;  %s654_s12 = smov %s509_s13 }
 0x149   : > { %s655_s13 = smov %s657_s17  ;;  %14 = sbr.rel (!%p12_p10) target bundleno = 4 (0x4), region = 71 }
 0x14e   :  { %309 = vsyncpa [#allocation4], 1 }
 0x14f   :  { %311 = vsyncpa [#allocation4 + $0x1], 1 }

</bundles_post_ra>
